<compile_context>
chip_gen: v7x
topology: tpu7x:2x2x1
jax: 0.10.0
libtpu: 0.0.40
codegen_flags: <defaults>
</compile_context>

<pallas_src>
import math
from functools import partial

import jax
import jax.numpy as jnp
from jax.experimental import pallas as pl
from jax.experimental.pallas import tpu as pltpu

_LANES = 128
_PARAM_ORDER = ("w1", "b1", "w2", "b2")

# Small-P fused fast-path gate: f32-upcast footprint of P (n * dpad * 4 bytes).
_FUSED_P_BYTES = 2 << 20
# Per-grid-step working-set budget for the tiled passes (double-buffered inputs
# plus f32 temporaries); kept well under the vmem_limit floor (v7x-safe).
_PASS1_TILE_BUDGET = 16 << 20


def _round_up(x, m):
    return ((x + m - 1) // m) * m


def _cdiv(a, b):
    return (a + b - 1) // b


def _default_vmem_limit():
    # Raise the scoped-VMEM limit explicitly: v5e defaults to 16 MiB (of 128),
    # v6e to 32 (of 128), v7x to 32 (of 64).  Use 3/4 of physical, capped 96 MiB.
    try:
        cap = int(pltpu.get_tpu_info().vmem_capacity_bytes)
        if cap <= 0:
            raise ValueError(cap)
        return int(min((cap * 3) // 4, 96 << 20))
    except Exception:
        return 48 << 20  # safe floor on every generation (v7x physical = 64 MiB)


_VMEM_LIMIT = _default_vmem_limit()


# ----------------------------------------------------------------------------
# Kernel 1: wrapped-model forward (Linear -> ReLU -> Linear).
# ----------------------------------------------------------------------------
def _mlp_fwd_kernel(x_ref, w1_ref, b1_ref, w2_ref, b2_ref, o_ref):
    h = jnp.dot(x_ref[...], w1_ref[...], preferred_element_type=jnp.float32)
    h = jnp.maximum(h + b1_ref[...], 0.0)  # ReLU
    y = jnp.dot(h, w2_ref[...], preferred_element_type=jnp.float32)
    o_ref[...] = (y + b2_ref[...]).astype(o_ref.dtype)


def mlp_forward(x, params):
    # TODO(synk): at production scale, also keep weights in bf16 to halve weight
    # DMA on the natively-bf16 MXUs of v6e/v7x.
    w1, b1, w2, b2 = params["w1"], params["b1"], params["w2"], params["b2"]
    B, Fin = x.shape
    H = w1.shape[1]
    Fout = w2.shape[1]
    b1r, b2r = b1.reshape(1, H), b2.reshape(1, Fout)

    TB = 256
    if B % TB == 0 and B // TB >= 2:
        # Batch-tiled, "parallel" grid -> MXU occupancy + v7x 2-TC sharding.
        return pl.pallas_call(
            _mlp_fwd_kernel,
            grid=(B // TB,),
            out_shape=jax.ShapeDtypeStruct((B, Fout), x.dtype),
            in_specs=[pl.BlockSpec((TB, Fin), lambda i: (i, 0)),
                      pl.BlockSpec((Fin, H), lambda i: (0, 0)),
                      pl.BlockSpec((1, H), lambda i: (0, 0)),
                      pl.BlockSpec((H, Fout), lambda i: (0, 0)),
                      pl.BlockSpec((1, Fout), lambda i: (0, 0))],
            out_specs=pl.BlockSpec((TB, Fout), lambda i: (i, 0)),
            compiler_params=pltpu.CompilerParams(
                dimension_semantics=("parallel",),
                vmem_limit_bytes=_VMEM_LIMIT),
        )(x, w1, b1r, w2, b2r)

    # Toy / small batch: grid-less, everything VMEM resident.
    vmem = lambda: pl.BlockSpec(memory_space=pltpu.MemorySpace.VMEM)
    return pl.pallas_call(
        _mlp_fwd_kernel,
        out_shape=jax.ShapeDtypeStruct((B, Fout), x.dtype),
        in_specs=[vmem() for _ in range(5)],
        out_specs=vmem(),
        compiler_params=pltpu.CompilerParams(vmem_limit_bytes=_VMEM_LIMIT),
    )(x, w1, b1r, w2, b2r)


# ----------------------------------------------------------------------------
# Kernel 2a: gk partials = P @ g, tiled over D-chunks (reduction pass).
#   grid = (nsplit, chunks): nsplit is "parallel" (v7x 2-TC), chunks "arbitrary".
#   Accumulate (n, 8, 128) partials with plain vector adds (VALU, hides under
#   DMA); cross-sublane + cross-lane reduce + lane replication only on the last
#   chunk.  Output block per split: (n, 128) lane-replicated gk partial.
# ----------------------------------------------------------------------------
def _gk_kernel(p_ref, g_ref, gk_ref, acc_ref):
    c = pl.program_id(1)

    @pl.when(c == 0)
    def _():
        acc_ref[...] = jnp.zeros_like(acc_ref)

    n, tr, L = p_ref.shape
    p = p_ref[...].astype(jnp.float32)                     # bf16 -> f32 (v5e-safe)
    contrib = p * g_ref[...][None, :, :]                   # (n, tr, L)
    # Group-sum over tr//8 vreg rows: pure vector adds, sublane axis preserved.
    acc_ref[...] += jnp.sum(contrib.reshape(n, tr // 8, 8, L), axis=1)

    @pl.when(c == pl.num_programs(1) - 1)
    def _():
        part = jnp.sum(acc_ref[...], axis=1)               # (n, L)  sublane reduce
        tot = jnp.sum(part, axis=1, keepdims=True)         # (n, 1)  lane reduce
        gk_ref[...] = jnp.broadcast_to(tot, gk_ref.shape)  # lane-replicated (n, L)


# ----------------------------------------------------------------------------
# Kernel 2b: g_proj = P^T @ gk, tiled over D-chunks (parallel writeback pass).
#   gk arrives lane-replicated (n, 128) -> only a cheap sublane broadcast per
#   chunk.  Output blocks are lane-dense (tr, 128) f32 (unmasked stores).
#   The unused ANY-space input is the padded gradient slab, aliased to the
#   output buffer (it is dead after pass 1).
# ----------------------------------------------------------------------------
def _proj_kernel(gk_ref, p_ref, g_alias_ref, o_ref):
    del g_alias_ref                                        # alias-only, never read
    p = p_ref[...].astype(jnp.float32)                     # (n, tr, L)
    gk = gk_ref[...]                                       # (n, L) lane-replicated
    o_ref[...] = jnp.sum(p * gk[:, None, :], axis=0).astype(o_ref.dtype)


# ----------------------------------------------------------------------------
# Kernel 2c: small-P fused fast path (P loaded into VMEM once, both matvecs).
# ----------------------------------------------------------------------------
def _fused_proj_kernel(p_ref, g_ref, o_ref):
    p = p_ref[...].astype(jnp.float32)                     # (n, R, L)
    g = g_ref[...]                                         # (R, L)
    gk = jnp.sum(p * g[None, :, :], axis=1)                # (n, L)
    gk = jnp.sum(gk, axis=1, keepdims=True)                # (n, 1)
    o_ref[...] = jnp.sum(p * gk[:, :, None], axis=0).astype(o_ref.dtype)


# ----------------------------------------------------------------------------
# Projection drivers.
# ----------------------------------------------------------------------------
def _p_sgd_fused(P3, g2d):
    n, R, L = P3.shape
    vmem = lambda: pl.BlockSpec(memory_space=pltpu.MemorySpace.VMEM)
    return pl.pallas_call(
        _fused_proj_kernel,
        out_shape=jax.ShapeDtypeStruct((R, L), jnp.float32),
        in_specs=[vmem(), vmem()],
        out_specs=vmem(),
        compiler_params=pltpu.CompilerParams(vmem_limit_bytes=_VMEM_LIMIT),
    )(P3, g2d)


def _p_sgd_tiled(P3, g2d, *, tr, nsplit, chunks):
    n, R, L = P3.shape
    total_chunks = nsplit * chunks

    # ---- pass 1: lane-replicated gk partials per split (reduction over chunks).
    gk_parts = pl.pallas_call(
        _gk_kernel,
        grid=(nsplit, chunks),
        out_shape=jax.ShapeDtypeStruct((nsplit, n, L), jnp.float32),
        in_specs=[pl.BlockSpec((n, tr, L), lambda h, c: (0, h * chunks + c, 0)),
                  pl.BlockSpec((tr, L), lambda h, c: (h * chunks + c, 0))],
        out_specs=pl.BlockSpec((None, n, L), lambda h, c: (h, 0, 0)),
        scratch_shapes=[pltpu.VMEM((n, 8, L), jnp.float32)],
        compiler_params=pltpu.CompilerParams(
            dimension_semantics=("parallel", "arbitrary"),
            vmem_limit_bytes=_VMEM_LIMIT),
    )(P3, g2d)

    gk_rep = jnp.sum(gk_parts, axis=0)  # (n, L) tiny combine across splits

    # ---- pass 2: projection writeback, parallel over all chunks.
    proj2d = pl.pallas_call(
        _proj_kernel,
        grid=(total_chunks,),
        out_shape=jax.ShapeDtypeStruct((R, L), jnp.float32),
        in_specs=[pl.BlockSpec((n, L), lambda c: (0, 0)),
                  pl.BlockSpec((n, tr, L), lambda c: (0, c, 0)),
                  pl.BlockSpec(memory_space=pl.ANY)],      # g2d: alias-only
        out_specs=pl.BlockSpec((tr, L), lambda c: (c, 0)),
        input_output_aliases={2: 0},                        # reuse g2d's HBM slab
        compiler_params=pltpu.CompilerParams(
            dimension_semantics=("parallel",),
            vmem_limit_bytes=_VMEM_LIMIT),
    )(gk_rep, P3, g2d)
    return proj2d


def _project_flat_impl(P3, gvec, *, d, tr, nsplit, chunks, fused):
    n, R, L = P3.shape
    dpad = R * L
    # TODO(synk): in a real training loop, keep grads persistently flat and
    # handle the ragged (dpad - d) tail with a masked store in the last chunk
    # instead of pad + slice.
    g2d = jnp.pad(gvec.astype(jnp.float32), (0, dpad - d)).reshape(R, L)
    if fused:
        proj2d = _p_sgd_fused(P3, g2d)
    else:
        proj2d = _p_sgd_tiled(P3, g2d, tr=tr, nsplit=nsplit, chunks=chunks)
    return proj2d.reshape(-1)[:d]


@partial(jax.jit, static_argnames=("d", "tr", "nsplit", "chunks", "fused"))
def _project_flat_vec(P3, gvec, *, d, tr, nsplit, chunks, fused):
    return _project_flat_impl(P3, gvec, d=d, tr=tr, nsplit=nsplit,
                              chunks=chunks, fused=fused)


@partial(jax.jit, static_argnames=("d", "tr", "nsplit", "chunks", "fused"))
def _project_grads(P3, grads, *, d, tr, nsplit, chunks, fused):
    # flatten -> pad -> project (Pallas) -> slice -> unflatten, all in one jit.
    g = jnp.concatenate([grads[k].reshape(-1).astype(jnp.float32)
                         for k in _PARAM_ORDER], 0)
    proj = _project_flat_impl(P3, g, d=d, tr=tr, nsplit=nsplit,
                              chunks=chunks, fused=fused)
    out, idx = {}, 0
    for k in _PARAM_ORDER:
        shp = grads[k].shape
        size = math.prod(shp)
        out[k] = proj[idx:idx + size].reshape(shp).astype(grads[k].dtype)
        idx += size
    return out


# ----------------------------------------------------------------------------
# Layout selection (adaptive chunk size, v7x split, fused fast-path gate).
# ----------------------------------------------------------------------------
def _pick_tr(n):
    # bytes per sublane row in pass 1: double-buffered inputs (P bf16 + g f32)
    # plus f32 temporaries (upcast + product).
    per_row = 2 * (n * _LANES * 2 + _LANES * 4) + 2 * n * _LANES * 4
    tr = _PASS1_TILE_BUDGET // per_row
    return max(64, min(2048, (tr // 8) * 8))


def _make_layout(n, d):
    r_rows = _cdiv(d, _LANES)
    if n * r_rows * _LANES * 4 <= _FUSED_P_BYTES:
        R = _round_up(r_rows, 8)
        return dict(d=d, R=R, tr=R, nsplit=1, chunks=1, fused=True)
    nsplit = 2 if r_rows >= 16 else 1          # 2-way split feeds v7x's 2 TCs
    tr = min(_pick_tr(n), _round_up(_cdiv(r_rows, nsplit), 8))
    chunks = _cdiv(r_rows, nsplit * tr)
    R = nsplit * chunks * tr
    return dict(d=d, R=R, tr=tr, nsplit=nsplit, chunks=chunks, fused=False)


def _pack_P(P_bf16, R):
    n, d = P_bf16.shape
    dpad = R * _LANES
    return jnp.pad(P_bf16, ((0, 0), (0, dpad - d))).reshape(n, R, _LANES)


# ----------------------------------------------------------------------------
# TAveragedModel — JAX port.
# ----------------------------------------------------------------------------
class TAveragedModel:
    def __init__(self, params):
        # deepcopy analogue: materialize our own copies of the arrays.
        self.params = {k: jnp.asarray(v) for k, v in params.items()}
        self.P = None            # (n, D) bf16 — analogue of torch self.P
        self.P3 = None           # (n, R, 128) bf16, padded kernel layout
        self.W = []
        self.n_averaged = jnp.array(0, dtype=jnp.int32)
        self._layout = None

    # forward(*args) == self.module(*args): Pallas MLP forward.
    def forward(self, x):
        return mlp_forward(x, self.params)

    # ---- param / grad flattening (glue, plain JAX) ----
    def get_model_param_vec(self, params):
        return jnp.concatenate([params[k].reshape(-1) for k in _PARAM_ORDER], 0)

    def get_model_grad_vec(self, grads):
        return jnp.concatenate([grads[k].reshape(-1) for k in _PARAM_ORDER], 0)

    # ---- subspace machinery ----
    def collect_solutions(self, params):
        self.W.append(self.get_model_param_vec(params))
        self.n_averaged = self.n_averaged + 1

    def fit_subspace(self):
        # TODO(synk): torch reference references an undefined `P` and never
        # normalizes row 0; we implement the intended modified Gram-Schmidt
        # (with a norm guard) so P^T P is a true orthogonal projector.
        W = jnp.stack(self.W, axis=0).astype(jnp.float32)   # (n, D)
        rows = []
        for i in range(W.shape[0]):
            v = W[i]
            if rows:
                Q = jnp.stack(rows, axis=0)
                v = v - Q.T @ (Q @ v)
            v = v / jnp.maximum(jnp.linalg.norm(v), 1e-12)
            rows.append(v)
        P = jnp.stack(rows, axis=0)                          # (n, D) orthonormal f32
        n, d = P.shape
        # bf16 storage: the projection kernels are HBM-bandwidth bound.
        self.P = P.astype(jnp.bfloat16)
        self._layout = _make_layout(n, d)
        self.P3 = _pack_P(self.P, self._layout["R"])

    # ---- gradient projection (hot path -> Pallas kernels, fused under jit) ----
    def P_SGD(self, grads):
        lay = self._layout
        return _project_grads(self.P3, grads, d=lay["d"], tr=lay["tr"],
                              nsplit=lay["nsplit"], chunks=lay["chunks"],
                              fused=lay["fused"])

    def update_parameters(self, grads):
        return self.P_SGD(grads)


# ----------------------------------------------------------------------------
if __name__ == "__main__":
    key = jax.random.PRNGKey(0)
    k_w1, k_w2, k_x, k_snap, k_grad, k_xb = jax.random.split(key, 6)

    # 128-lane-aligned wrapped-model sizes.
    B, Fin, H, Fout = 8, 128, 128, 128
    params = {
        "w1": 0.1 * jax.random.normal(k_w1, (Fin, H), jnp.float32),
        "b1": jnp.zeros((H,), jnp.float32),
        "w2": 0.1 * jax.random.normal(k_w2, (H, Fout), jnp.float32),
        "b2": jnp.zeros((Fout,), jnp.float32),
    }

    swa = TAveragedModel(params)

    # ---- forward pass (passthrough to wrapped module) via Pallas kernels ----
    x = jax.random.normal(k_x, (B, Fin), jnp.float32)
    y = swa.forward(x)                                     # grid-less path
    xb = jax.random.normal(k_xb, (512, Fin), jnp.float32)
    yb = swa.forward(xb)                                   # batch-tiled parallel path

    # ---- collect snapshots, fit subspace, project fake gradients ----
    for kk in jax.random.split(k_snap, 3):
        pkeys = jax.random.split(kk, len(_PARAM_ORDER))
        perturbed = {
            name: params[name] + 0.01 * jax.random.normal(pk, params[name].shape, jnp.float32)
            for name, pk in zip(_PARAM_ORDER, pkeys)
        }
        swa.collect_solutions(perturbed)
    swa.fit_subspace()

    gkeys = jax.random.split(k_grad, len(_PARAM_ORDER))
    fake_grads = {
        name: jax.random.normal(gk, params[name].shape, jnp.float32)
        for name, gk in zip(_PARAM_ORDER, gkeys)
    }
    proj_grads = swa.update_parameters(fake_grads)         # small-P fused path

    # ---- exercise the large-D two-pass tiled path (big adaptive chunks,
    #      2-way "parallel" reduce split, gk lane-replication, output aliasing).
    n_big, d_big = 4, 1_200_000
    kp, kgv = jax.random.split(jax.random.PRNGKey(1))
    P_big = jax.random.normal(kp, (n_big, d_big), jnp.float32).astype(jnp.bfloat16)
    g_big = jax.random.normal(kgv, (d_big,), jnp.float32)
    lay_big = _make_layout(n_big, d_big)
    assert not lay_big["fused"]
    P3_big = _pack_P(P_big, lay_big["R"])
    pv_big = _project_flat_vec(P3_big, g_big, d=d_big, tr=lay_big["tr"],
                               nsplit=lay_big["nsplit"], chunks=lay_big["chunks"],
                               fused=lay_big["fused"])

    jax.block_until_ready((y, yb, proj_grads, pv_big))

    # ---- correctness checks against pure-JAX (elementwise f32) references ----
    assert y.shape == (B, Fout)
    h_ref = jnp.maximum(x @ params["w1"] + params["b1"], 0.0)
    y_ref = h_ref @ params["w2"] + params["b2"]
    assert jnp.allclose(y, y_ref, atol=5e-2, rtol=5e-2), \
        float(jnp.max(jnp.abs(y - y_ref)))

    hb_ref = jnp.maximum(xb @ params["w1"] + params["b1"], 0.0)
    yb_ref = hb_ref @ params["w2"] + params["b2"]
    assert jnp.allclose(yb, yb_ref, atol=5e-2, rtol=5e-2), \
        float(jnp.max(jnp.abs(yb - yb_ref)))

    gvec = swa.get_model_grad_vec(fake_grads).astype(jnp.float32)
    Pf = swa.P.astype(jnp.float32)          # same bf16-quantized P the kernel streams
    gk_r = jnp.sum(Pf * gvec[None, :], axis=1)
    ref = jnp.sum(Pf * gk_r[:, None], axis=0)
    pv = swa.get_model_grad_vec(proj_grads)
    assert jnp.allclose(pv, ref, atol=1e-3, rtol=1e-3), \
        float(jnp.max(jnp.abs(pv - ref)))

    Pf_big = P_big.astype(jnp.float32)
    gk_big = jnp.sum(Pf_big * g_big[None, :], axis=1)
    ref_big = jnp.sum(Pf_big * gk_big[:, None], axis=0)
    rel_err = jnp.max(jnp.abs(pv_big - ref_big)) / (jnp.max(jnp.abs(ref_big)) + 1e-6)
    assert rel_err < 1e-2, float(rel_err)

    print("KERNEL_OK")
</pallas_src>

<mosaic_0001>
module attributes {stable_mosaic.version = 11 : i64} {
  func.func @_mlp_fwd_kernel(%arg0: memref<8x128xf32, #tpu.memory_space<vmem>>, %arg1: memref<128x128xf32, #tpu.memory_space<vmem>>, %arg2: memref<1x128xf32, #tpu.memory_space<vmem>>, %arg3: memref<128x128xf32, #tpu.memory_space<vmem>>, %arg4: memref<1x128xf32, #tpu.memory_space<vmem>>, %arg5: memref<8x128xf32, #tpu.memory_space<vmem>>) attributes {dimension_semantics = [], scalar_prefetch = 0 : i64, scratch_operands = 0 : i64, tpu.core_type = #tpu.core_type<tc>} {
    %c0 = arith.constant 0 : index
    %c0_0 = arith.constant 0 : index
    %0 = vector.load %arg0[%c0, %c0_0] : memref<8x128xf32, #tpu.memory_space<vmem>>, vector<8x128xf32>
    %c0_1 = arith.constant 0 : index
    %c0_2 = arith.constant 0 : index
    %1 = vector.load %arg1[%c0_1, %c0_2] : memref<128x128xf32, #tpu.memory_space<vmem>>, vector<128x128xf32>
    %cst = arith.constant dense<0.000000e+00> : vector<8x128xf32>
    %2 = tpu.matmul %0, %1, %cst {dimension_numbers = #tpu.dot_dimension_numbers<[1], [0], [0], [1], [0, 0, 1, 1], [], []>} : vector<8x128xf32>, vector<128x128xf32>, vector<8x128xf32> -> vector<8x128xf32>
    %c0_3 = arith.constant 0 : index
    %c0_4 = arith.constant 0 : index
    %3 = vector.load %arg2[%c0_3, %c0_4] : memref<1x128xf32, #tpu.memory_space<vmem>>, vector<1x128xf32>
    %4 = vector.broadcast %3 : vector<1x128xf32> to vector<8x128xf32>
    %5 = arith.addf %2, %4 : vector<8x128xf32>
    %cst_5 = arith.constant 0.000000e+00 : f32
    %6 = vector.broadcast %cst_5 : f32 to vector<8x128xf32>
    %7 = arith.maximumf %5, %6 : vector<8x128xf32>
    %c0_6 = arith.constant 0 : index
    %c0_7 = arith.constant 0 : index
    %8 = vector.load %arg3[%c0_6, %c0_7] : memref<128x128xf32, #tpu.memory_space<vmem>>, vector<128x128xf32>
    %cst_8 = arith.constant dense<0.000000e+00> : vector<8x128xf32>
    %9 = tpu.matmul %7, %8, %cst_8 {dimension_numbers = #tpu.dot_dimension_numbers<[1], [0], [0], [1], [0, 0, 1, 1], [], []>} : vector<8x128xf32>, vector<128x128xf32>, vector<8x128xf32> -> vector<8x128xf32>
    %c0_9 = arith.constant 0 : index
    %c0_10 = arith.constant 0 : index
    %10 = vector.load %arg4[%c0_9, %c0_10] : memref<1x128xf32, #tpu.memory_space<vmem>>, vector<1x128xf32>
    %11 = vector.broadcast %10 : vector<1x128xf32> to vector<8x128xf32>
    %12 = arith.addf %9, %11 : vector<8x128xf32>
    %c0_11 = arith.constant 0 : index
    %c0_12 = arith.constant 0 : index
    %13 = vector.load %arg5[%c0_11, %c0_12] : memref<8x128xf32, #tpu.memory_space<vmem>>, vector<8x128xf32>
    tpu.vector_store %arg5[%c0_11, %c0_12], %12 {strides = array<i32>} : memref<8x128xf32, #tpu.memory_space<vmem>>, vector<8x128xf32>,
    return
  }
}

</mosaic_0001>

<bundles_post_ra>
// kernel: tpu_custom_call.1
= control target key start
LH: loop header
LB: loop body
LE: loop exit
PB: predicated region body
PF: predicated region fallthrough
CT: control target
= control target key end

     0   :  { %10 = vsyncpa [#allocation3], 0  ;;  %s637_s0 = inlined_call_operand.hbm [shape: f32[8,128], index: 0, kind: input, shape index: {}]   ;;  %s638_s1 = inlined_call_operand.hbm [shape: f32[128,128], index: 1, kind: input, shape index: {}]   ;;  %s639_s2 = inlined_call_operand.vmem [shape: f32[1,128], index: 2, kind: input, shape index: {}]   ;;  %s640_s3 = inlined_call_operand.hbm [shape: f32[128,128], index: 3, kind: input, shape index: {}]   ;;  %s641_s4 = inlined_call_operand.vmem [shape: f32[1,128], index: 4, kind: input, shape index: {}]   ;;  %s642_s5 = inlined_call_operand.hbm [shape: f32[8,128], index: 5, kind: output, shape index: {}]  }
   0x1   :  { %11 = vsyncpa [#allocation6], 0 }
   0x2   :  { %12 = vsyncpa [#allocation4], 0  ;;  %s522_s18 = smov [#allocation5]   ;;  %s428_s22 = scalar_lea.hbm %s638_s1, 2048 }
   0x3   :  { %s28_s19 = sshll.u32 %s522_s18, 4  ;;  %p429_p0 = scmp.ne.s32.totalorder %s638_s1, %s428_s22  ;;  %s29_s19 = int_to_ptr.vmem [resolvable:$true] %s28_s19 }
   0x4   :  { %p432_p1 = scmp.lt.u32.totalorder %s428_s22, %s638_s1 }
   0x6   :  { %p434_p2 = pnand %p432_p1, %p429_p0 }
   0x8   :  { %437 = shalt.err (!%p434_p2)
}
   0x9   :  { %s438_s27 = scalar_lea.vmem %s29_s19, 2048  ;;  %p443_p4 = scmp.lt.s32.totalorder %s29_s19, %s29_s19 }
   0xa   :  { %p439_p3 = scmp.ne.s32.totalorder %s29_s19, %s438_s27  ;;  %p444_p5 = scmp.lt.s32.totalorder %s438_s27, %s438_s27 }
   0xc   :  { %p445_p6 = por %p444_p5, %p443_p4 }
   0xe   :  { %p446_p7 = pnand %p445_p6, %p439_p3 }
  0x10   :  { %449 = shalt.err (!%p446_p7)
}
  0x11   :  { %s523_s28 = smov 128   ;;  %s524_s29 = smov 8  }
  0x12   :  { %34 = dma.hbm_to_vmem [thread:$0]  %s638_s1, 2048, %s29_s19, [#allocation6], %s523_s28, %s523_s28, %s524_s29  }
  0x13   :  { %s525_s7 = smov [#allocation2]   ;;  %s526_s9 = smov [#allocation7]  }
  0x14   :  { %s19_s8 = sshll.u32 %s525_s7, 4  ;;  %s42_s10 = sshll.u32 %s526_s9, 4  ;;  %s20_s8 = int_to_ptr.vmem [resolvable:$true] %s19_s8  ;;  %s43_s10 = int_to_ptr.vmem [resolvable:$true] %s42_s10 }
  0x15   :  { %s450_s13 = scalar_lea.hbm %s637_s0, 128 }
  0x16   :  { %p451_p8 = scmp.ne.s32.totalorder %s637_s0, %s450_s13  ;;  %p454_p9 = scmp.lt.u32.totalorder %s450_s13, %s637_s0 }
  0x18   :  { %p456_p10 = pnand %p454_p9, %p451_p8 }
  0x1a   :  { %459 = shalt.err (!%p456_p10)
}
  0x1b   :  { %s460_s1 = scalar_lea.vmem %s20_s8, 128  ;;  %p465_p12 = scmp.lt.s32.totalorder %s20_s8, %s20_s8 }
  0x1c   :  { %p461_p11 = scmp.ne.s32.totalorder %s20_s8, %s460_s1  ;;  %p466_p13 = scmp.lt.s32.totalorder %s460_s1, %s460_s1 }
  0x1e   :  { %p467_p0 = por %p466_p13, %p465_p12 }
  0x20   :  { %p468_p1 = pnand %p467_p0, %p461_p11 }
  0x22   :  { %471 = shalt.err (!%p468_p1)
}
  0x23   :  { %22 = dma.hbm_to_vmem [thread:$0]  %s637_s0, 128, %s20_s8, [#allocation3]  }
  0x24   :  { %s472_s22 = scalar_lea.hbm %s640_s3, 2048 }
  0x25   :  { %p473_p2 = scmp.ne.s32.totalorder %s640_s3, %s472_s22  ;;  %p476_p3 = scmp.lt.u32.totalorder %s472_s22, %s640_s3 }
  0x27   :  { %p478_p4 = pnand %p476_p3, %p473_p2 }
  0x29   :  { %481 = shalt.err (!%p478_p4)
}
  0x2a   :  { %s482_s27 = scalar_lea.vmem %s43_s10, 2048  ;;  %p487_p6 = scmp.lt.s32.totalorder %s43_s10, %s43_s10 }
  0x2b   :  { %p483_p5 = scmp.ne.s32.totalorder %s43_s10, %s482_s27  ;;  %p488_p7 = scmp.lt.s32.totalorder %s482_s27, %s482_s27 }
  0x2d   :  { %p489_p8 = por %p488_p7, %p487_p6 }
  0x2f   :  { %p490_p9 = pnand %p489_p8, %p483_p5 }
  0x31   :  { %493 = shalt.err (!%p490_p9)
}
  0x32   :  { %48 = dma.hbm_to_vmem [thread:$0]  %s640_s3, 2048, %s43_s10, [#allocation6], %s523_s28, %s523_s28, %s524_s29  }
  0x33   :  { %516 = dma.done.wait [#allocation3], 128  }
  0x34   :  { %517 = vsyncadd [#allocation3], 4294967168 }
  0x35   :  { %518 = dma.done.wait [#allocation6], 4096  }
  0x36   :  { %519 = vsyncadd [#allocation6], 4294963200  ;;  %v527_v0 = vmov 0.0|0.0   ;;  %vm528_vm0 = vmmov 0   ;;  %v529_v1 = vmov 0.0   ;;  %v61_v2 = vld [vmem:[#allocation5] sm:$0xff] }
  0x37   :  { %371 = vmatprep.subr.bf16.mxu0 %v527_v0  ;;  %333 = vmatprep.mubr.msk.f32.mxu0 %vm528_vm0, %v529_v1  ;;  %v62_v3 = vld [vmem:[#allocation5 + $0x8] sm:$0xff]  ;;  %v63_v4 = vld [vmem:[#allocation5 + $0x10] sm:$0xff]  ;;  %v64_v6 = vld [vmem:[#allocation5 + $0x18] sm:$0xff]  ;;  %s530_s7 = smov [#allocation8]  }
  0x38   :  { %395 = vmatprep.subr.bf16.mxu1 %v527_v0  ;;  %368 = vmatprep.mubr.msk.f32.mxu1 %vm528_vm0, %v529_v1  ;;  %v372_v5 = vpack.c.bf16 %v62_v3, %v61_v2  ;;  %v375_v7 = vpack.c.bf16 %v64_v6, %v63_v4  ;;  %v65_v8 = vld [vmem:[#allocation5 + $0x20] sm:$0xff]  ;;  %v66_v9 = vld [vmem:[#allocation5 + $0x28] sm:$0xff]  ;;  %v157_v12 = vld [vmem:[#allocation7 + $0x10] sm:$0xff]  ;;  %s255_s8 = sshll.u32 %s530_s7, 4  ;;  %s256_s8 = int_to_ptr.vmem [resolvable:$true] %s255_s8 }
  0x39   :  { %v155_v10 = vld [vmem:[#allocation7] sm:$0xff]  ;;  %v156_v11 = vld [vmem:[#allocation7 + $0x8] sm:$0xff]  ;;  %v158_v13 = vld [vmem:[#allocation7 + $0x18] sm:$0xff]  ;;  %v378_v14 = vpack.c.bf16 %v66_v9, %v65_v8  ;;  %s494_s9 = scalar_lea.vmem %s256_s8, 128  ;;  %p499_p11 = scmp.lt.s32.totalorder %s256_s8, %s256_s8 }
  0x3a   :  { %373 = vmatpush3.bf16.msra.mxu0 %v372_v5  ;;  %v396_v15 = vpack.c.bf16 %v156_v11, %v155_v10  ;;  %v67_v16 = vld [vmem:[#allocation5 + $0x30] sm:$0xff]  ;;  %v68_v17 = vld [vmem:[#allocation5 + $0x38] sm:$0xff]  ;;  %v399_v18 = vpack.c.bf16 %v158_v13, %v157_v12  ;;  %v159_v19 = vld [vmem:[#allocation7 + $0x20] sm:$0xff]  ;;  %p495_p10 = scmp.ne.s32.totalorder %s256_s8, %s494_s9  ;;  %p500_p12 = scmp.lt.s32.totalorder %s494_s9, %s494_s9 }
  0x3b   :  { %374 = vmatprep.subr.bf16.mxu0 %v527_v0  ;;  %v160_v20 = vld [vmem:[#allocation7 + $0x28] sm:$0xff]  ;;  %v381_v21 = vpack.c.bf16 %v68_v17, %v67_v16  ;;  %v69_v22 = vld [vmem:[#allocation5 + $0x40] sm:$0xff]  ;;  %v161_v25 = vld [vmem:[#allocation7 + $0x30] sm:$0xff] }
  0x3c   :  { %397 = vmatpush3.bf16.msra.mxu1 %v396_v15  ;;  %v70_v23 = vld [vmem:[#allocation5 + $0x48] sm:$0xff]  ;;  %v402_v24 = vpack.c.bf16 %v160_v20, %v159_v19  ;;  %v162_v26 = vld [vmem:[#allocation7 + $0x38] sm:$0xff]  ;;  %v71_v28 = vld [vmem:[#allocation5 + $0x50] sm:$0xff]  ;;  %p501_p13 = por %p500_p12, %p499_p11 }
  0x3d   :  { %398 = vmatprep.subr.bf16.mxu1 %v527_v0  ;;  %v384_v27 = vpack.c.bf16 %v70_v23, %v69_v22  ;;  %v72_v29 = vld [vmem:[#allocation5 + $0x58] sm:$0xff]  ;;  %v405_v30 = vpack.c.bf16 %v162_v26, %v161_v25  ;;  %v163_v31 = vld [vmem:[#allocation7 + $0x40] sm:$0xff]  ;;  %v164_v32 = vld [vmem:[#allocation7 + $0x48] sm:$0xff] }
  0x3e   :  { %376 = vmatpush3.bf16.msra.mxu0 %v375_v7  ;;  %v387_v33 = vpack.c.bf16 %v72_v29, %v71_v28  ;;  %v73_v34 = vld [vmem:[#allocation5 + $0x60] sm:$0xff]  ;;  %v74_v35 = vld [vmem:[#allocation5 + $0x68] sm:$0xff]  ;;  %v408_v36 = vpack.c.bf16 %v164_v32, %v163_v31  ;;  %v165_v37 = vld [vmem:[#allocation7 + $0x50] sm:$0xff]  ;;  %p502_p0 = pnand %p501_p13, %p495_p10 }
  0x3f   :  { %377 = vmatprep.subr.bf16.mxu0 %v527_v0  ;;  %v166_v38 = vld [vmem:[#allocation7 + $0x58] sm:$0xff]  ;;  %v390_v39 = vpack.c.bf16 %v74_v35, %v73_v34  ;;  %v75_v40 = vld [vmem:[#allocation5 + $0x70] sm:$0xff]  ;;  %v167_v43 = vld [vmem:[#allocation7 + $0x60] sm:$0xff] }
  0x40   :  { %400 = vmatpush3.bf16.msra.mxu1 %v399_v18  ;;  %v76_v41 = vld [vmem:[#allocation5 + $0x78] sm:$0xff]  ;;  %v411_v42 = vpack.c.bf16 %v166_v38, %v165_v37  ;;  %v168_v44 = vld [vmem:[#allocation7 + $0x68] sm:$0xff]  ;;  %v169_v48 = vld [vmem:[#allocation7 + $0x70] sm:$0xff] }
  0x41   :  { %401 = vmatprep.subr.bf16.mxu1 %v527_v0  ;;  %v393_v45 = vpack.c.bf16 %v76_v41, %v75_v40  ;;  %v414_v46 = vpack.c.bf16 %v168_v44, %v167_v43  ;;  %v60_v47 = vld [vmem:[#allocation2] sm:$0xff] }
  0x42   :  { %379 = vmatpush3.bf16.msra.mxu0 %v378_v14  ;;  %v170_v49 = vld [vmem:[#allocation7 + $0x78] sm:$0xff] }
  0x43   :  { %380 = vmatprep.subr.bf16.mxu0 %v527_v0  ;;  %v417_v50 = vpack.c.bf16 %v170_v49, %v169_v48  ;;  %v265_v51 = vld [vmem:[%s639_s2] ss:$0 sm:$0xff] }
  0x44   :  { %403 = vmatpush3.bf16.msra.mxu1 %v402_v24  ;;  %v266_v56 = vld [vmem:[%s641_s4] ss:$0 sm:$0xff] }
  0x45   :  { %404 = vmatprep.subr.bf16.mxu1 %v527_v0 }
  0x46   :  { %382 = vmatpush3.bf16.msra.mxu0 %v381_v21 }
  0x47   :  { %383 = vmatprep.subr.bf16.mxu0 %v527_v0 }
  0x48   :  { %406 = vmatpush3.bf16.msra.mxu1 %v405_v30 }
  0x49   :  { %407 = vmatprep.subr.bf16.mxu1 %v527_v0 }
  0x4a   :  { %385 = vmatpush3.bf16.msra.mxu0 %v384_v27 }
  0x4b   :  { %386 = vmatprep.subr.bf16.mxu0 %v527_v0 }
  0x4c   :  { %409 = vmatpush3.bf16.msra.mxu1 %v408_v36 }
  0x4d   :  { %410 = vmatprep.subr.bf16.mxu1 %v527_v0 }
  0x4e   :  { %388 = vmatpush3.bf16.msra.mxu0 %v387_v33 }
  0x4f   :  { %389 = vmatprep.subr.bf16.mxu0 %v527_v0 }
  0x50   :  { %412 = vmatpush3.bf16.msra.mxu1 %v411_v42 }
  0x51   :  { %413 = vmatprep.subr.bf16.mxu1 %v527_v0 }
  0x52   :  { %391 = vmatpush3.bf16.msra.mxu0 %v390_v39 }
  0x53   :  { %392 = vmatprep.subr.bf16.mxu0 %v527_v0 }
  0x54   :  { %415 = vmatpush3.bf16.msra.mxu1 %v414_v46 }
  0x55   :  { %416 = vmatprep.subr.bf16.mxu1 %v527_v0 }
  0x56   :  { %394 = vmatpush3.bf16.msra.mxu0 %v393_v45 }
  0x58   :  { %418 = vmatpush3.bf16.msra.mxu1 %v417_v50 }
  0x59   :  { %334 = vmatmul.mubr.f32.vlgmr.msra.gmra.mrb[0].mxu0 %v60_v47 }
 0x12c   :  { %v150_v52 = vpop.f32.mrb[0].mxu0 }
 0x12d   :  { %v151_v53 = vadd.f32 %v265_v51, %v150_v52  ;;  %v335_v54 = vpop.f32.mrb[1].mxu0 }
 0x12f   :  { %v154_v55 = vmax.f32 %v151_v53, 0.0 }
 0x131   :  { %369 = vmatmul.mubr.f32.vlgmr.msra.gmra.mrb[0].mxu1 %v154_v55 }
 0x204   :  { %v244_v57 = vpop.f32.mrb[0].mxu1 }
 0x205   :  { %v245_v58 = vadd.f32 %v266_v56, %v244_v57  ;;  %v370_v59 = vpop.f32.mrb[1].mxu1 }
 0x207   :  { %248 = vst [vmem:[#allocation8] sm:$0xff] %v245_v58 }
 0x208   :  { %505 = shalt.err (!%p502_p0)
}
 0x209   :  { %s506_s11 = scalar_lea.hbm %s642_s5, 128 }
 0x20a   :  { %p507_p1 = scmp.ne.s32.totalorder %s642_s5, %s506_s11  ;;  %p510_p2 = scmp.lt.u32.totalorder %s506_s11, %s642_s5 }
 0x20c   :  { %p512_p3 = pnand %p510_p2, %p507_p1 }
 0x20e   :  { %515 = shalt.err (!%p512_p3)
}
 0x20f   :  { %258 = dma.vmem_to_hbm [thread:$0]  %s256_s8, 128, %s642_s5, [#allocation4]  }
 0x210   :  { %520 = dma.done.wait [#allocation4], 128  }
 0x211   :  { %521 = vsyncadd [#allocation4], 4294967168 }
 0x212   :  { %262 = vsyncpa [#allocation3], 1 }
 0x213   :  { %263 = vsyncpa [#allocation6], 1 }
 0x214   :  { %264 = vsyncpa [#allocation4], 1 }

</bundles_post_ra>
